<compile_context>
chip_gen: v7x
topology: tpu7x:2x2x1
jax: 0.10.0
libtpu: 0.0.40
codegen_flags: <defaults>
</compile_context>

<pallas_src>
import functools

import jax
import jax.numpy as jnp
from jax.experimental import pallas as pl
from jax.experimental.pallas import tpu as pltpu

LANE = 128
SUBLANE = 8


def _round_up(n: int, m: int) -> int:
    return (n + m - 1) // m * m


def _ff_kernel(x_ref,
               w_in_ref, b_in_ref,
               w_h1_ref, b_h1_ref,
               w_h2_ref, b_h2_ref,
               w_out_ref, b_out_ref,
               o_ref):
    """Full 4-layer MLP on one batch tile.

    bf16 operands -> MXU, f32 accumulation, bf16 activations between layers.
    """
    x = x_ref[...]                                               # (bt, in_p) bf16

    h = jnp.dot(x, w_in_ref[...], preferred_element_type=jnp.float32)
    h = jnp.maximum(h + b_in_ref[...], 0.0).astype(jnp.bfloat16)

    h = jnp.dot(h, w_h1_ref[...], preferred_element_type=jnp.float32)
    h = jnp.maximum(h + b_h1_ref[...], 0.0).astype(jnp.bfloat16)

    h = jnp.dot(h, w_h2_ref[...], preferred_element_type=jnp.float32)
    h = jnp.maximum(h + b_h2_ref[...], 0.0).astype(jnp.bfloat16)

    y = jnp.dot(h, w_out_ref[...], preferred_element_type=jnp.float32)
    o_ref[...] = (y + b_out_ref[...]).astype(o_ref.dtype)        # (bt, out_p) f32


@functools.partial(jax.jit, static_argnames=("max_batch_tile",))
def torch_ff_forward(x, params, *, max_batch_tile=512):
    """params: dict with w_in, b_in, w_h1, b_h1, w_h2, b_h2, w_out, b_out.

    Weight layouts: w_* are (in_features, out_features) f32; b_* are (1, out) f32.
    Casting / padding to bf16 + lane multiples is done here (wrapper side).
    """
    B, in_size = x.shape
    hidden = params["w_in"].shape[1]
    out_size = params["w_out"].shape[1]

    # Lane-dense feature padding: 784 -> 896, 10 -> 128.
    in_p = _round_up(in_size, LANE)
    out_p = _round_up(out_size, LANE)

    # Batch tile: one invocation for small batches; otherwise cap the tile so
    # large batches keep >= 2 parallel grid steps (2 TCs on v7x) and the f32
    # intermediates stay out of the spill regime.
    if B <= max_batch_tile:
        bt = _round_up(B, SUBLANE)
    else:
        bt = max_batch_tile
    B_p = _round_up(B, bt)
    grid = (B_p // bt,)

    # ---- pad + cast operands (zero padding is exact, sliced off below) ----
    x_p = jnp.zeros((B_p, in_p), jnp.bfloat16).at[:B, :in_size].set(
        x.astype(jnp.bfloat16))

    w_in = jnp.zeros((in_p, hidden), jnp.bfloat16).at[:in_size, :].set(
        params["w_in"].astype(jnp.bfloat16))
    w_h1 = params["w_h1"].astype(jnp.bfloat16)
    w_h2 = params["w_h2"].astype(jnp.bfloat16)
    w_out = jnp.zeros((hidden, out_p), jnp.bfloat16).at[:, :out_size].set(
        params["w_out"].astype(jnp.bfloat16))

    b_in = params["b_in"].astype(jnp.float32)
    b_h1 = params["b_h1"].astype(jnp.float32)
    b_h2 = params["b_h2"].astype(jnp.float32)
    b_out = jnp.zeros((1, out_p), jnp.float32).at[:, :out_size].set(
        params["b_out"].astype(jnp.float32))

    # Grid-invariant weights/biases: constant block index, single buffer.
    resident = lambda shape: pl.BlockSpec(
        shape, lambda i: (0, 0), pipeline_mode=pl.Buffered(1))

    out_padded = pl.pallas_call(
        _ff_kernel,
        out_shape=jax.ShapeDtypeStruct((B_p, out_p), jnp.float32),
        grid_spec=pltpu.PrefetchScalarGridSpec(
            num_scalar_prefetch=0,
            grid=grid,
            in_specs=[
                pl.BlockSpec((bt, in_p), lambda i: (i, 0)),      # x: batch tiled
                resident((in_p, hidden)), resident((1, hidden)),
                resident((hidden, hidden)), resident((1, hidden)),
                resident((hidden, hidden)), resident((1, hidden)),
                resident((hidden, out_p)), resident((1, out_p)),
            ],
            out_specs=pl.BlockSpec((bt, out_p), lambda i: (i, 0)),
        ),
        compiler_params=pltpu.CompilerParams(
            dimension_semantics=("parallel",),
            # bt=512: ~1.75 MiB (2x bf16 x tiles) + ~0.5 MiB (2x f32 out tiles)
            # + ~0.33 MiB resident bf16 weights + intermediates  <<  32 MiB.
            vmem_limit_bytes=32 * 1024 * 1024,
        ),
    )(x_p,
      w_in, b_in, w_h1, b_h1, w_h2, b_h2, w_out, b_out)

    return out_padded[:B, :out_size].astype(x.dtype)


def init_params(key, input_size=784, hidden_size=128, output_size=10,
                dtype=jnp.float32):
    """Deterministic init mimicking nn.Linear's U(-1/sqrt(fan_in), 1/sqrt(fan_in))."""
    def linear(k, fan_in, fan_out):
        kw, kb = jax.random.split(k)
        bound = 1.0 / jnp.sqrt(fan_in)
        # stored as (in, out) so forward is x @ W (== x @ W_torch.T)
        w = jax.random.uniform(kw, (fan_in, fan_out), dtype, -bound, bound)
        b = jax.random.uniform(kb, (1, fan_out), dtype, -bound, bound)
        return w, b

    k0, k1, k2, k3 = jax.random.split(key, 4)
    w_in, b_in = linear(k0, input_size, hidden_size)
    w_h1, b_h1 = linear(k1, hidden_size, hidden_size)
    w_h2, b_h2 = linear(k2, hidden_size, hidden_size)
    w_out, b_out = linear(k3, hidden_size, output_size)
    return dict(w_in=w_in, b_in=b_in, w_h1=w_h1, b_h1=b_h1,
                w_h2=w_h2, b_h2=b_h2, w_out=w_out, b_out=b_out)


def reference_forward_f32(x, p):
    """Pure-JAX f32 reference matching TorchFF.forward semantics."""
    h = jnp.maximum(x @ p["w_in"] + p["b_in"], 0.0)
    h = jnp.maximum(h @ p["w_h1"] + p["b_h1"], 0.0)
    h = jnp.maximum(h @ p["w_h2"] + p["b_h2"], 0.0)
    return h @ p["w_out"] + p["b_out"]


def reference_forward_bf16(x, p):
    """Reference that matches the kernel's numerics exactly:
    bf16 operands, f32 MXU accumulation, bf16 inter-layer activations."""
    def lin(a, w, b):
        return jnp.dot(a.astype(jnp.bfloat16), w.astype(jnp.bfloat16),
                       preferred_element_type=jnp.float32) + b
    h = jnp.maximum(lin(x, p["w_in"], p["b_in"]), 0.0).astype(jnp.bfloat16)
    h = jnp.maximum(lin(h, p["w_h1"], p["b_h1"]), 0.0).astype(jnp.bfloat16)
    h = jnp.maximum(lin(h, p["w_h2"], p["b_h2"]), 0.0).astype(jnp.bfloat16)
    return lin(h, p["w_out"], p["b_out"])


if __name__ == "__main__":
    key = jax.random.PRNGKey(0)
    k_param, k_x, k_x2 = jax.random.split(key, 3)

    input_size, hidden_size, output_size = 784, 128, 10
    params = init_params(k_param, input_size, hidden_size, output_size)

    # --- small batch: single kernel invocation (grid collapses to 1 step) ---
    batch = 8
    x = jax.random.normal(k_x, (batch, input_size), jnp.float32)
    out = jax.block_until_ready(torch_ff_forward(x, params))
    assert out.shape == (batch, output_size)

    ref_bf16 = reference_forward_bf16(x, params)
    ref_f32 = reference_forward_f32(x, params)
    assert jnp.allclose(out, ref_bf16, atol=2e-3, rtol=2e-3), \
        "mismatch vs bf16-matched reference"
    assert jnp.allclose(out, ref_f32, atol=5e-2, rtol=5e-2), \
        "mismatch vs f32 reference (beyond bf16 tolerance)"

    # --- larger, non-multiple batch: exercises batch padding + multi-step
    #     parallel grid with bigger per-step tiles ---
    batch2 = 1000
    x2 = jax.random.normal(k_x2, (batch2, input_size), jnp.float32)
    out2 = jax.block_until_ready(
        torch_ff_forward(x2, params, max_batch_tile=256))
    assert out2.shape == (batch2, output_size)
    ref2 = reference_forward_bf16(x2, params)
    assert jnp.allclose(out2, ref2, atol=2e-3, rtol=2e-3), \
        "mismatch vs bf16-matched reference (tiled batch)"

    print("KERNEL_OK")
</pallas_src>

<mosaic_0001>
module attributes {stable_mosaic.version = 11 : i64} {
  func.func @_ff_kernel(%arg0: i32, %arg1: memref<8x896xbf16, #tpu.memory_space<vmem>>, %arg2: memref<896x128xbf16, #tpu.memory_space<vmem>>, %arg3: memref<1x128xf32, #tpu.memory_space<vmem>>, %arg4: memref<128x128xbf16, #tpu.memory_space<vmem>>, %arg5: memref<1x128xf32, #tpu.memory_space<vmem>>, %arg6: memref<128x128xbf16, #tpu.memory_space<vmem>>, %arg7: memref<1x128xf32, #tpu.memory_space<vmem>>, %arg8: memref<128x128xbf16, #tpu.memory_space<vmem>>, %arg9: memref<1x128xf32, #tpu.memory_space<vmem>>, %arg10: memref<8x128xf32, #tpu.memory_space<vmem>>) attributes {dimension_semantics = [#tpu.dimension_semantics<parallel>], iteration_bounds = array<i64: 1>, scalar_prefetch = 0 : i64, scratch_operands = 0 : i64, tpu.core_type = #tpu.core_type<tc>, window_params = [{transform_indices = @transform_0, window_bounds = array<i64: 8, 896>}, {pipeline_mode = #tpu.pipeline_mode<synchronous>, transform_indices = @transform_1, window_bounds = array<i64: 896, 128>}, {pipeline_mode = #tpu.pipeline_mode<synchronous>, transform_indices = @transform_2, window_bounds = array<i64: 1, 128>}, {pipeline_mode = #tpu.pipeline_mode<synchronous>, transform_indices = @transform_3, window_bounds = array<i64: 128, 128>}, {pipeline_mode = #tpu.pipeline_mode<synchronous>, transform_indices = @transform_4, window_bounds = array<i64: 1, 128>}, {pipeline_mode = #tpu.pipeline_mode<synchronous>, transform_indices = @transform_5, window_bounds = array<i64: 128, 128>}, {pipeline_mode = #tpu.pipeline_mode<synchronous>, transform_indices = @transform_6, window_bounds = array<i64: 1, 128>}, {pipeline_mode = #tpu.pipeline_mode<synchronous>, transform_indices = @transform_7, window_bounds = array<i64: 128, 128>}, {pipeline_mode = #tpu.pipeline_mode<synchronous>, transform_indices = @transform_8, window_bounds = array<i64: 1, 128>}, {transform_indices = @transform_9, window_bounds = array<i64: 8, 128>}]} {
    %c0 = arith.constant 0 : index
    %c0_0 = arith.constant 0 : index
    %0 = vector.load %arg1[%c0, %c0_0] : memref<8x896xbf16, #tpu.memory_space<vmem>>, vector<8x896xbf16>
    %c0_1 = arith.constant 0 : index
    %c0_2 = arith.constant 0 : index
    %1 = vector.load %arg2[%c0_1, %c0_2] : memref<896x128xbf16, #tpu.memory_space<vmem>>, vector<896x128xbf16>
    %cst = arith.constant dense<0.000000e+00> : vector<8x128xf32>
    %2 = tpu.matmul %0, %1, %cst {dimension_numbers = #tpu.dot_dimension_numbers<[1], [0], [0], [1], [0, 0, 1, 1], [], []>} : vector<8x896xbf16>, vector<896x128xbf16>, vector<8x128xf32> -> vector<8x128xf32>
    %c0_3 = arith.constant 0 : index
    %c0_4 = arith.constant 0 : index
    %3 = vector.load %arg3[%c0_3, %c0_4] : memref<1x128xf32, #tpu.memory_space<vmem>>, vector<1x128xf32>
    %4 = vector.broadcast %3 : vector<1x128xf32> to vector<8x128xf32>
    %5 = arith.addf %2, %4 : vector<8x128xf32>
    %cst_5 = arith.constant 0.000000e+00 : f32
    %6 = vector.broadcast %cst_5 : f32 to vector<8x128xf32>
    %7 = arith.maximumf %5, %6 : vector<8x128xf32>
    %8 = arith.truncf %7 : vector<8x128xf32> to vector<8x128xbf16>
    %c0_6 = arith.constant 0 : index
    %c0_7 = arith.constant 0 : index
    %9 = vector.load %arg4[%c0_6, %c0_7] : memref<128x128xbf16, #tpu.memory_space<vmem>>, vector<128x128xbf16>
    %cst_8 = arith.constant dense<0.000000e+00> : vector<8x128xf32>
    %10 = tpu.matmul %8, %9, %cst_8 {dimension_numbers = #tpu.dot_dimension_numbers<[1], [0], [0], [1], [0, 0, 1, 1], [], []>} : vector<8x128xbf16>, vector<128x128xbf16>, vector<8x128xf32> -> vector<8x128xf32>
    %c0_9 = arith.constant 0 : index
    %c0_10 = arith.constant 0 : index
    %11 = vector.load %arg5[%c0_9, %c0_10] : memref<1x128xf32, #tpu.memory_space<vmem>>, vector<1x128xf32>
    %12 = vector.broadcast %11 : vector<1x128xf32> to vector<8x128xf32>
    %13 = arith.addf %10, %12 : vector<8x128xf32>
    %cst_11 = arith.constant 0.000000e+00 : f32
    %14 = vector.broadcast %cst_11 : f32 to vector<8x128xf32>
    %15 = arith.maximumf %13, %14 : vector<8x128xf32>
    %16 = arith.truncf %15 : vector<8x128xf32> to vector<8x128xbf16>
    %c0_12 = arith.constant 0 : index
    %c0_13 = arith.constant 0 : index
    %17 = vector.load %arg6[%c0_12, %c0_13] : memref<128x128xbf16, #tpu.memory_space<vmem>>, vector<128x128xbf16>
    %cst_14 = arith.constant dense<0.000000e+00> : vector<8x128xf32>
    %18 = tpu.matmul %16, %17, %cst_14 {dimension_numbers = #tpu.dot_dimension_numbers<[1], [0], [0], [1], [0, 0, 1, 1], [], []>} : vector<8x128xbf16>, vector<128x128xbf16>, vector<8x128xf32> -> vector<8x128xf32>
    %c0_15 = arith.constant 0 : index
    %c0_16 = arith.constant 0 : index
    %19 = vector.load %arg7[%c0_15, %c0_16] : memref<1x128xf32, #tpu.memory_space<vmem>>, vector<1x128xf32>
    %20 = vector.broadcast %19 : vector<1x128xf32> to vector<8x128xf32>
    %21 = arith.addf %18, %20 : vector<8x128xf32>
    %cst_17 = arith.constant 0.000000e+00 : f32
    %22 = vector.broadcast %cst_17 : f32 to vector<8x128xf32>
    %23 = arith.maximumf %21, %22 : vector<8x128xf32>
    %24 = arith.truncf %23 : vector<8x128xf32> to vector<8x128xbf16>
    %c0_18 = arith.constant 0 : index
    %c0_19 = arith.constant 0 : index
    %25 = vector.load %arg8[%c0_18, %c0_19] : memref<128x128xbf16, #tpu.memory_space<vmem>>, vector<128x128xbf16>
    %cst_20 = arith.constant dense<0.000000e+00> : vector<8x128xf32>
    %26 = tpu.matmul %24, %25, %cst_20 {dimension_numbers = #tpu.dot_dimension_numbers<[1], [0], [0], [1], [0, 0, 1, 1], [], []>} : vector<8x128xbf16>, vector<128x128xbf16>, vector<8x128xf32> -> vector<8x128xf32>
    %c0_21 = arith.constant 0 : index
    %c0_22 = arith.constant 0 : index
    %27 = vector.load %arg9[%c0_21, %c0_22] : memref<1x128xf32, #tpu.memory_space<vmem>>, vector<1x128xf32>
    %28 = vector.broadcast %27 : vector<1x128xf32> to vector<8x128xf32>
    %29 = arith.addf %26, %28 : vector<8x128xf32>
    %c0_23 = arith.constant 0 : index
    %c0_24 = arith.constant 0 : index
    %30 = vector.load %arg10[%c0_23, %c0_24] : memref<8x128xf32, #tpu.memory_space<vmem>>, vector<8x128xf32>
    tpu.vector_store %arg10[%c0_23, %c0_24], %29 {strides = array<i32>} : memref<8x128xf32, #tpu.memory_space<vmem>>, vector<8x128xf32>,
    return
  }
  func.func @transform_0(%arg0: i32) -> (i32, i32) {
    %c0_i32 = arith.constant 0 : i32
    %c0_i32_0 = arith.constant 0 : i32
    return %arg0, %c0_i32 : i32, i32
  }
  func.func @transform_1(%arg0: i32) -> (i32, i32) {
    %c0_i32 = arith.constant 0 : i32
    %c0_i32_0 = arith.constant 0 : i32
    %c0_i32_1 = arith.constant 0 : i32
    return %c0_i32, %c0_i32_0 : i32, i32
  }
  func.func @transform_2(%arg0: i32) -> (i32, i32) {
    %c0_i32 = arith.constant 0 : i32
    %c0_i32_0 = arith.constant 0 : i32
    %c0_i32_1 = arith.constant 0 : i32
    return %c0_i32, %c0_i32_0 : i32, i32
  }
  func.func @transform_3(%arg0: i32) -> (i32, i32) {
    %c0_i32 = arith.constant 0 : i32
    %c0_i32_0 = arith.constant 0 : i32
    %c0_i32_1 = arith.constant 0 : i32
    return %c0_i32, %c0_i32_0 : i32, i32
  }
  func.func @transform_4(%arg0: i32) -> (i32, i32) {
    %c0_i32 = arith.constant 0 : i32
    %c0_i32_0 = arith.constant 0 : i32
    %c0_i32_1 = arith.constant 0 : i32
    return %c0_i32, %c0_i32_0 : i32, i32
  }
  func.func @transform_5(%arg0: i32) -> (i32, i32) {
    %c0_i32 = arith.constant 0 : i32
    %c0_i32_0 = arith.constant 0 : i32
    %c0_i32_1 = arith.constant 0 : i32
    return %c0_i32, %c0_i32_0 : i32, i32
  }
  func.func @transform_6(%arg0: i32) -> (i32, i32) {
    %c0_i32 = arith.constant 0 : i32
    %c0_i32_0 = arith.constant 0 : i32
    %c0_i32_1 = arith.constant 0 : i32
    return %c0_i32, %c0_i32_0 : i32, i32
  }
  func.func @transform_7(%arg0: i32) -> (i32, i32) {
    %c0_i32 = arith.constant 0 : i32
    %c0_i32_0 = arith.constant 0 : i32
    %c0_i32_1 = arith.constant 0 : i32
    return %c0_i32, %c0_i32_0 : i32, i32
  }
  func.func @transform_8(%arg0: i32) -> (i32, i32) {
    %c0_i32 = arith.constant 0 : i32
    %c0_i32_0 = arith.constant 0 : i32
    %c0_i32_1 = arith.constant 0 : i32
    return %c0_i32, %c0_i32_0 : i32, i32
  }
  func.func @transform_9(%arg0: i32) -> (i32, i32) {
    %c0_i32 = arith.constant 0 : i32
    %c0_i32_0 = arith.constant 0 : i32
    return %arg0, %c0_i32 : i32, i32
  }
}

</mosaic_0001>

<bundles_post_ra>
// kernel: torch_ff_forward.1
= control target key start
LH: loop header
LB: loop body
LE: loop exit
PB: predicated region body
PF: predicated region fallthrough
CT: control target
= control target key end

     0   :  { %v1419_v42 = vmov 0.0   ;;  %vm1420_vm0 = vmmov 0   ;;  %s1788_s0 = inlined_call_operand.vmem [shape: bf16[8,896], index: 0, kind: input, shape index: {}]   ;;  %s1789_s1 = inlined_call_operand.vmem [shape: bf16[896,128], index: 1, kind: input, shape index: {}]   ;;  %s1790_s2 = inlined_call_operand.vmem [shape: f32[1,128], index: 2, kind: input, shape index: {}]   ;;  %s1791_s3 = inlined_call_operand.vmem [shape: bf16[128,128], index: 3, kind: input, shape index: {}]   ;;  %s1792_s4 = inlined_call_operand.vmem [shape: f32[1,128], index: 4, kind: input, shape index: {}]   ;;  %s1793_s5 = inlined_call_operand.vmem [shape: bf16[128,128], index: 5, kind: input, shape index: {}]   ;;  %s1794_s6 = inlined_call_operand.vmem [shape: f32[1,128], index: 6, kind: input, shape index: {}]   ;;  %s1795_s7 = inlined_call_operand.vmem [shape: bf16[128,128], index: 7, kind: input, shape index: {}]   ;;  %s1796_s8 = inlined_call_operand.vmem [shape: f32[1,128], index: 8, kind: input, shape index: {}]   ;;  %s1797_s9 = inlined_call_operand.hbm [shape: f32[8,128], index: 9, kind: output, shape index: {}]  }
   0x1   :  { %v1308_v0 = vld [vmem:[%s1789_s1 + $0x40] sm:$0xff]   ;;  %v1312_v4 = vld [vmem:[%s1789_s1 + $0x48] sm:$0xff]   ;;  %v1316_v8 = vld [vmem:[%s1789_s1 + $0x50] sm:$0xff]  }
   0x2   :  { %v1309_v1 = vld [vmem:[%s1789_s1] sm:$0xff]   ;;  %1123 = vmatprep.subr.bf16.mxu0 %v1308_v0  ;;  %v1313_v5 = vld [vmem:[%s1789_s1 + $0x8] sm:$0xff]   ;;  %v1317_v9 = vld [vmem:[%s1789_s1 + $0x10] sm:$0xff]  }
   0x3   :  { %v1310_v2 = vld [vmem:[%s1789_s1 + $0xc0] sm:$0xff]   ;;  %1124 = vmatpush3.bf16.msra.mxu0 %v1309_v1  ;;  %v1314_v6 = vld [vmem:[%s1789_s1 + $0xc8] sm:$0xff]   ;;  %v1318_v10 = vld [vmem:[%s1789_s1 + $0xd0] sm:$0xff]  }
   0x4   :  { %v1311_v3 = vld [vmem:[%s1789_s1 + $0x80] sm:$0xff]   ;;  %1145 = vmatprep.subr.bf16.mxu1 %v1310_v2  ;;  %1125 = vmatprep.subr.bf16.mxu0 %v1312_v4  ;;  %v1315_v7 = vld [vmem:[%s1789_s1 + $0x88] sm:$0xff]   ;;  %v1319_v11 = vld [vmem:[%s1789_s1 + $0x90] sm:$0xff]  }
   0x5   :  { %1146 = vmatpush3.bf16.msra.mxu1 %v1311_v3  ;;  %v1320_v12 = vld [vmem:[%s1789_s1 + $0x58] sm:$0xff]   ;;  %v1324_v16 = vld [vmem:[%s1789_s1 + $0x60] sm:$0xff]   ;;  %v1328_v20 = vld [vmem:[%s1789_s1 + $0x68] sm:$0xff]  }
   0x6   :  { %1147 = vmatprep.subr.bf16.mxu1 %v1314_v6  ;;  %v1321_v13 = vld [vmem:[%s1789_s1 + $0x18] sm:$0xff]   ;;  %v1325_v17 = vld [vmem:[%s1789_s1 + $0x20] sm:$0xff]   ;;  %v1329_v21 = vld [vmem:[%s1789_s1 + $0x28] sm:$0xff]  }
   0x7   :  { %1126 = vmatpush3.bf16.msra.mxu0 %v1313_v5  ;;  %v1322_v14 = vld [vmem:[%s1789_s1 + $0xd8] sm:$0xff]   ;;  %v1326_v18 = vld [vmem:[%s1789_s1 + $0xe0] sm:$0xff]   ;;  %v1330_v22 = vld [vmem:[%s1789_s1 + $0xe8] sm:$0xff]  }
   0x8   :  { %1127 = vmatprep.subr.bf16.mxu0 %v1316_v8  ;;  %v1323_v15 = vld [vmem:[%s1789_s1 + $0x98] sm:$0xff]   ;;  %v1327_v19 = vld [vmem:[%s1789_s1 + $0xa0] sm:$0xff]   ;;  %v1331_v23 = vld [vmem:[%s1789_s1 + $0xa8] sm:$0xff]  }
   0x9   :  { %1148 = vmatpush3.bf16.msra.mxu1 %v1315_v7  ;;  %v1332_v24 = vld [vmem:[%s1789_s1 + $0x70] sm:$0xff]   ;;  %v1336_v28 = vld [vmem:[%s1789_s1 + $0x78] sm:$0xff]   ;;  %v34_v31 = vld [vmem:[%s1788_s0] sm:$0xff] }
   0xa   :  { %1149 = vmatprep.subr.bf16.mxu1 %v1318_v10  ;;  %v1333_v25 = vld [vmem:[%s1789_s1 + $0x30] sm:$0xff]   ;;  %v1337_v29 = vld [vmem:[%s1789_s1 + $0x38] sm:$0xff]   ;;  %v1033_v32 = vcombine.low %v34_v31, %v34_v31  ;;  %v1034_v33 = vcombine.high %v34_v31, %v34_v31  ;;  %v1342_v35 = vld [vmem:[%s1789_s1 + $0x140] sm:$0xff]  }
   0xb   :  { %1128 = vmatpush3.bf16.msra.mxu0 %v1317_v9  ;;  %v1334_v26 = vld [vmem:[%s1789_s1 + $0xf0] sm:$0xff]   ;;  %v1338_v30 = vld [vmem:[%s1789_s1 + $0xf8] sm:$0xff]   ;;  %v35_v36 = vld [vmem:[%s1788_s0 + $0x8] sm:$0xff] }
   0xc   :  { %1129 = vmatprep.subr.bf16.mxu0 %v1320_v12  ;;  %v1335_v27 = vld [vmem:[%s1789_s1 + $0xb0] sm:$0xff]   ;;  %v1341_v34 = vld [vmem:[%s1789_s1 + $0xb8] sm:$0xff]   ;;  %550 = vmatprep.mubr.bf16.mxu0 %v1034_v33  ;;  %v1035_v37 = vcombine.low %v35_v36, %v35_v36  ;;  %v1036_v38 = vcombine.high %v35_v36, %v35_v36  ;;  %v1345_v39 = vld [vmem:[%s1789_s1 + $0x100] sm:$0xff]  }
   0xd   :  { %1150 = vmatpush3.bf16.msra.mxu1 %v1319_v11  ;;  %v1346_v40 = vld [vmem:[%s1789_s1 + $0x180] sm:$0xff]   ;;  %v1347_v41 = vld [vmem:[%s1789_s1 + $0x148] sm:$0xff]   ;;  %v1350_v45 = vld [vmem:[%s1789_s1 + $0x150] sm:$0xff]  }
   0xe   :  { %1151 = vmatprep.subr.bf16.mxu1 %v1322_v14  ;;  %590 = vmatprep.mubr.bf16.mxu1 %v1036_v38  ;;  %v1348_v43 = vld [vmem:[%s1789_s1 + $0x108] sm:$0xff]   ;;  %v1351_v46 = vld [vmem:[%s1789_s1 + $0x110] sm:$0xff]   ;;  %v1353_v48 = vld [vmem:[%s1789_s1 + $0x158] sm:$0xff]  }
   0xf   :  { %1130 = vmatpush3.bf16.msra.mxu0 %v1321_v13  ;;  %v1349_v44 = vld [vmem:[%s1789_s1 + $0x188] sm:$0xff]   ;;  %v1352_v47 = vld [vmem:[%s1789_s1 + $0x190] sm:$0xff]   ;;  %v1354_v49 = vld [vmem:[%s1789_s1 + $0x118] sm:$0xff]  }
  0x10   :  { %1131 = vmatprep.subr.bf16.mxu0 %v1324_v16  ;;  %v1356_v50 = vld [vmem:[%s1789_s1 + $0x160] sm:$0xff]   ;;  %v1355_v51 = vld [vmem:[%s1789_s1 + $0x198] sm:$0xff]   ;;  %v1359_v53 = vld [vmem:[%s1789_s1 + $0x168] sm:$0xff]  }
  0x11   :  { %1152 = vmatpush3.bf16.msra.mxu1 %v1323_v15  ;;  %v1357_v52 = vld [vmem:[%s1789_s1 + $0x120] sm:$0xff]   ;;  %v1360_v55 = vld [vmem:[%s1789_s1 + $0x128] sm:$0xff]   ;;  %v1362_v56 = vld [vmem:[%s1789_s1 + $0x170] sm:$0xff]  }
  0x12   :  { %1153 = vmatprep.subr.bf16.mxu1 %v1326_v18  ;;  %v1358_v54 = vld [vmem:[%s1789_s1 + $0x1a0] sm:$0xff]   ;;  %v1361_v57 = vld [vmem:[%s1789_s1 + $0x1a8] sm:$0xff]   ;;  %v1363_v58 = vld [vmem:[%s1789_s1 + $0x130] sm:$0xff]  }
  0x13   :  { %1132 = vmatpush3.bf16.msra.mxu0 %v1325_v17  ;;  %v36_v59 = vld [vmem:[%s1788_s0 + $0x10] sm:$0xff]  ;;  %v1365_v62 = vld [vmem:[%s1789_s1 + $0x178] sm:$0xff]  }
  0x14   :  { %1133 = vmatprep.subr.bf16.mxu0 %v1328_v20  ;;  %v1364_v60 = vld [vmem:[%s1789_s1 + $0x1b0] sm:$0xff]   ;;  %v1038_v61 = vcombine.high %v36_v59, %v36_v59  ;;  %v1366_v63 = vld [vmem:[%s1789_s1 + $0x138] sm:$0xff]   ;;  %v1037_v1 = vcombine.low %v36_v59, %v36_v59 }
  0x15   :  { %1154 = vmatpush3.bf16.msra.mxu1 %v1327_v19  ;;  %v1369_v0 = vld [vmem:[%s1789_s1 + $0x1b8] sm:$0xff]  }
  0x16   :  { %1155 = vmatprep.subr.bf16.mxu1 %v1330_v22  ;;  %v1370_v2 = vld [vmem:[%s1788_s0 + $0x18] ss:$0 sps:$4 sm:$0xff]  }
  0x17   :  { %1134 = vmatpush3.bf16.msra.mxu0 %v1329_v21 }
  0x18   :  { %1135 = vmatprep.subr.bf16.mxu0 %v1332_v24 }
  0x19   :  { %1156 = vmatpush3.bf16.msra.mxu1 %v1331_v23 }
  0x1a   :  { %1157 = vmatprep.subr.bf16.mxu1 %v1334_v26 }
  0x1b   :  { %1136 = vmatpush3.bf16.msra.mxu0 %v1333_v25 }
  0x1c   :  { %1137 = vmatprep.subr.bf16.mxu0 %v1336_v28 }
  0x1d   :  { %1158 = vmatpush3.bf16.msra.mxu1 %v1335_v27 }
  0x1e   :  { %1159 = vmatprep.subr.bf16.mxu1 %v1338_v30 }
  0x1f   :  { %1138 = vmatpush3.bf16.msra.mxu0 %v1337_v29 }
  0x20   :  { %1167 = vmatprep.subr.bf16.mxu0 %v1342_v35 }
  0x21   :  { %1160 = vmatpush3.bf16.msra.mxu1 %v1341_v34 }
  0x22   :  { %551 = vmatmul.mubr.bf16.vlgmr.msra.gmra.mrb[0].mxu0 %v1033_v32  ;;  %1225 = vmatprep.subr.bf16.mxu1 %v1419_v42 }
  0x23   :  { %1168 = vmatpush3.bf16.msra.mxu0 %v1345_v39  ;;  %630 = vmatprep.mubr.bf16.mxu0 %v1038_v61 }
  0x24   :  { %591 = vmatmul.mubr.bf16.vlgmr.msra.gmra.mrb[0].mxu1 %v1035_v37  ;;  %1169 = vmatprep.subr.bf16.mxu0 %v1347_v41 }
  0x25   :  { %1226 = vmatpush3.bf16.msra.mxu1 %v1346_v40  ;;  %1241 = vmatprep.mubr.msk.bf16.mxu1 %vm1420_vm0, %v1419_v42 }
  0x26   :  { %1227 = vmatprep.subr.bf16.mxu1 %v1419_v42 }
  0x27   :  { %1170 = vmatpush3.bf16.msra.mxu0 %v1348_v43 }
  0x28   :  { %1171 = vmatprep.subr.bf16.mxu0 %v1350_v45 }
  0x29   :  { %1228 = vmatpush3.bf16.msra.mxu1 %v1349_v44 }
  0x2a   :  { %1229 = vmatprep.subr.bf16.mxu1 %v1419_v42 }
  0x2b   :  { %1172 = vmatpush3.bf16.msra.mxu0 %v1351_v46 }
  0x2c   :  { %1173 = vmatprep.subr.bf16.mxu0 %v1353_v48 }
  0x2d   :  { %1230 = vmatpush3.bf16.msra.mxu1 %v1352_v47 }
  0x2e   :  { %1231 = vmatprep.subr.bf16.mxu1 %v1419_v42 }
  0x2f   :  { %1174 = vmatpush3.bf16.msra.mxu0 %v1354_v49 }
  0x30   :  { %1175 = vmatprep.subr.bf16.mxu0 %v1356_v50 }
  0x31   :  { %1232 = vmatpush3.bf16.msra.mxu1 %v1355_v51 }
  0x32   :  { %1233 = vmatprep.subr.bf16.mxu1 %v1419_v42 }
  0x33   :  { %1176 = vmatpush3.bf16.msra.mxu0 %v1357_v52 }
  0x34   :  { %1177 = vmatprep.subr.bf16.mxu0 %v1359_v53 }
  0x35   :  { %1234 = vmatpush3.bf16.msra.mxu1 %v1358_v54 }
  0x36   :  { %1235 = vmatprep.subr.bf16.mxu1 %v1419_v42 }
  0x37   :  { %1178 = vmatpush3.bf16.msra.mxu0 %v1360_v55 }
  0x38   :  { %1179 = vmatprep.subr.bf16.mxu0 %v1362_v56 }
  0x39   :  { %1236 = vmatpush3.bf16.msra.mxu1 %v1361_v57 }
  0x3a   :  { %1237 = vmatprep.subr.bf16.mxu1 %v1419_v42 }
  0x3b   :  { %1180 = vmatpush3.bf16.msra.mxu0 %v1363_v58 }
  0x3c   :  { %1181 = vmatprep.subr.bf16.mxu0 %v1365_v62 }
  0x3d   :  { %1238 = vmatpush3.bf16.msra.mxu1 %v1364_v60 }
  0x3e   :  { %1239 = vmatprep.subr.bf16.mxu1 %v1419_v42 }
  0x3f   :  { %1182 = vmatpush3.bf16.msra.mxu0 %v1366_v63 }
  0x40   :  { %1245 = vmatprep.subr.bf16.mxu0 %v1419_v42 }
  0x41   :  { %1240 = vmatpush3.bf16.msra.mxu1 %v1369_v0 }
  0x42   :  { %631 = vmatmul.mubr.bf16.vlgmr.msra.gmra.mrb[4].mxu0 %v1037_v1  ;;  %1265 = vmatprep.subr.bf16.mxu1 %v1419_v42 }
  0x43   :  { %1261 = vmatprep.mubr.msk.bf16.mxu0 %vm1420_vm0, %v1419_v42 }
  0x44   :  { %1242 = vmatmul.mubr.bf16.vlgmr.msra.gmra.mrb[4].mxu1 %v1370_v2 }
  0x45   :  { %1281 = vmatprep.mubr.msk.bf16.mxu1 %vm1420_vm0, %v1419_v42 }
  0x46   :  { %14 = vsyncpa [#allocation3], 0  ;;  %v1371_v3 = vld [vmem:[%s1791_s3] sm:$0xff]   ;;  %v1372_v4 = vld [vmem:[%s1791_s3 + $0x8] sm:$0xff]   ;;  %s1421_s27 = smov [#allocation2]  }
  0x47   :  { %1246 = vmatpush3.bf16.msra.mxu0 %v1371_v3  ;;  %v1373_v5 = vld [vmem:[%s1791_s3 + $0x10] sm:$0xff]   ;;  %v1374_v6 = vld [vmem:[%s1791_s3 + $0x18] sm:$0xff]   ;;  %v1375_v7 = vld [vmem:[%s1791_s3 + $0x20] sm:$0xff]  }
  0x48   :  { %1247 = vmatprep.subr.bf16.mxu0 %v1419_v42  ;;  %v1376_v8 = vld [vmem:[%s1791_s3 + $0x28] sm:$0xff]   ;;  %v1377_v9 = vld [vmem:[%s1791_s3 + $0x30] sm:$0xff]   ;;  %v1378_v10 = vld [vmem:[%s1791_s3 + $0x38] sm:$0xff]  }
  0x49   :  { %v1379_v11 = vld [vmem:[%s1793_s5] sm:$0xff]   ;;  %v1380_v12 = vld [vmem:[%s1793_s5 + $0x8] sm:$0xff]   ;;  %v1381_v13 = vld [vmem:[%s1793_s5 + $0x10] sm:$0xff]  }
  0x4a   :  { %1266 = vmatpush3.bf16.msra.mxu1 %v1379_v11  ;;  %v1382_v14 = vld [vmem:[%s1793_s5 + $0x18] sm:$0xff]   ;;  %v1383_v15 = vld [vmem:[%s1793_s5 + $0x20] sm:$0xff]   ;;  %v1384_v16 = vld [vmem:[%s1793_s5 + $0x28] sm:$0xff]  }
  0x4b   :  { %1248 = vmatpush3.bf16.msra.mxu0 %v1372_v4  ;;  %1267 = vmatprep.subr.bf16.mxu1 %v1419_v42  ;;  %v1032_v18 = vld [vmem:[%s1790_s2] ss:$0 sm:$0xff]  ;;  %v1385_v44 = vld [vmem:[%s1793_s5 + $0x30] sm:$0xff]   ;;  %v1386_v45 = vld [vmem:[%s1793_s5 + $0x38] sm:$0xff]   ;;  %s1024_s2 = sshll.u32 %s1421_s27, 4  ;;  %s1025_s2 = int_to_ptr.vmem [resolvable:$true] %s1024_s2 }
  0x4c   :  { %1249 = vmatprep.subr.bf16.mxu0 %v1419_v42  ;;  %v1387_v46 = vld [vmem:[%s1795_s7] sm:$0xff]   ;;  %v1388_v47 = vld [vmem:[%s1795_s7 + $0x8] sm:$0xff]   ;;  %v1389_v48 = vld [vmem:[%s1795_s7 + $0x10] sm:$0xff]   ;;  %p1400_p1 = scmp.lt.s32.totalorder %s1025_s2, %s1025_s2 }
  0x4d   :  { %v1390_v49 = vld [vmem:[%s1795_s7 + $0x18] sm:$0xff]   ;;  %v1391_v50 = vld [vmem:[%s1795_s7 + $0x20] sm:$0xff]   ;;  %v1392_v51 = vld [vmem:[%s1795_s7 + $0x28] sm:$0xff]  }
  0x4e   :  { %1268 = vmatpush3.bf16.msra.mxu1 %v1380_v12  ;;  %v1096_v52 = vld [vmem:[%s1792_s4] ss:$0 sm:$0xff]  ;;  %v1393_v60 = vld [vmem:[%s1795_s7 + $0x30] sm:$0xff]   ;;  %v1394_v61 = vld [vmem:[%s1795_s7 + $0x38] sm:$0xff]  }
  0x4f   :  { %1250 = vmatpush3.bf16.msra.mxu0 %v1373_v5  ;;  %1269 = vmatprep.subr.bf16.mxu1 %v1419_v42  ;;  %v1105_v62 = vld [vmem:[%s1794_s6] ss:$0 sm:$0xff]  ;;  %s1395_s6 = scalar_lea.vmem %s1025_s2, 128 }
  0x50   :  { %1251 = vmatprep.subr.bf16.mxu0 %v1419_v42  ;;  %p1396_p0 = scmp.ne.s32.totalorder %s1025_s2, %s1395_s6  ;;  %p1401_p2 = scmp.lt.s32.totalorder %s1395_s6, %s1395_s6 }
  0x52   :  { %1270 = vmatpush3.bf16.msra.mxu1 %v1381_v13  ;;  %p1402_p3 = por %p1401_p2, %p1400_p1 }
  0x53   :  { %1252 = vmatpush3.bf16.msra.mxu0 %v1374_v6  ;;  %1271 = vmatprep.subr.bf16.mxu1 %v1419_v42 }
  0x54   :  { %1253 = vmatprep.subr.bf16.mxu0 %v1419_v42  ;;  %p1403_p4 = pnand %p1402_p3, %p1396_p0 }
  0x56   :  { %1272 = vmatpush3.bf16.msra.mxu1 %v1382_v14 }
  0x57   :  { %1254 = vmatpush3.bf16.msra.mxu0 %v1375_v7  ;;  %1273 = vmatprep.subr.bf16.mxu1 %v1419_v42 }
  0x58   :  { %1255 = vmatprep.subr.bf16.mxu0 %v1419_v42 }
  0x5a   :  { %1274 = vmatpush3.bf16.msra.mxu1 %v1383_v15 }
  0x5b   :  { %1256 = vmatpush3.bf16.msra.mxu0 %v1376_v8  ;;  %1275 = vmatprep.subr.bf16.mxu1 %v1419_v42 }
  0x5c   :  { %1257 = vmatprep.subr.bf16.mxu0 %v1419_v42 }
  0x5e   :  { %1276 = vmatpush3.bf16.msra.mxu1 %v1384_v16 }
  0x5f   :  { %1258 = vmatpush3.bf16.msra.mxu0 %v1377_v9  ;;  %1277 = vmatprep.subr.bf16.mxu1 %v1419_v42 }
  0x60   :  { %1259 = vmatprep.subr.bf16.mxu0 %v1419_v42 }
  0x62   :  { %1278 = vmatpush3.bf16.msra.mxu1 %v1385_v44 }
  0x63   :  { %1260 = vmatpush3.bf16.msra.mxu0 %v1378_v10  ;;  %1279 = vmatprep.subr.bf16.mxu1 %v1419_v42 }
  0x64   :  { %1285 = vmatprep.subr.bf16.mxu0 %v1419_v42 }
  0x66   :  { %1280 = vmatpush3.bf16.msra.mxu1 %v1386_v45 }
  0xf5   :  { %v1139_v17 = vpop.f32.mrb[0].mxu0 }
  0xf6   :  { %v1140_v19 = vpop.f32.mrb[1].mxu0 }
  0xf7   :  { %v1141_v20 = vadd.f32 %v1140_v19, %v1139_v17  ;;  %v1142_v21 = vpop.f32.mrb[2].mxu0  ;;  %v1161_v22 = vpop.f32.mrb[0].mxu1 }
  0xf8   :  { %v1143_v23 = vpop.f32.mrb[3].mxu0  ;;  %v1162_v24 = vpop.f32.mrb[1].mxu1 }
  0xf9   :  { %v553_v25 = vadd.f32 %v1141_v20, %v1032_v18  ;;  %v1163_v26 = vadd.f32 %v1162_v24, %v1161_v22  ;;  %v1164_v27 = vpop.f32.mrb[2].mxu1 }
  0xfa   :  { %v1165_v28 = vpop.f32.mrb[3].mxu1 }
  0xfb   :  { %v593_v29 = vadd.f32 %v1163_v26, %v553_v25 }
 0x115   :  { %v1183_v30 = vpop.f32.mrb[4].mxu0 }
 0x116   :  { %v1184_v31 = vpop.f32.mrb[5].mxu0 }
 0x117   :  { %v1185_v32 = vadd.f32 %v1184_v31, %v1183_v30  ;;  %v1186_v33 = vpop.f32.mrb[6].mxu0  ;;  %v672_v34 = vpop.f32.mrb[4].mxu1 }
 0x118   :  { %v1187_v35 = vpop.f32.mrb[7].mxu0  ;;  %v1243_v36 = vpop.f32.mrb[5].mxu1 }
 0x119   :  { %v633_v37 = vadd.f32 %v1185_v32, %v593_v29  ;;  %v675_v38 = vpop.f32.mrb[6].mxu1 }
 0x11a   :  { %v1244_v39 = vpop.f32.mrb[7].mxu1 }
 0x11b   :  { %v673_v40 = vadd.f32 %v672_v34, %v633_v37 }
 0x11d   :  { %v678_v41 = vmax.f32 %v673_v40, 0.0 }
 0x11f   :  { %v679_v43 = vpack.c.bf16 %v678_v41, %v678_v41 }
 0x121   :  { %1262 = vmatmul.mubr.bf16.vlgmr.msra.gmra.mrb[8].mxu0 %v679_v43 }
 0x122   :  { %1301 = vmatprep.mubr.msk.bf16.mxu0 %vm1420_vm0, %v1419_v42  ;;  %1286 = vmatpush3.bf16.msra.mxu0 %v1387_v46 }
 0x123   :  { %1287 = vmatprep.subr.bf16.mxu0 %v1419_v42 }
 0x126   :  { %1288 = vmatpush3.bf16.msra.mxu0 %v1388_v47 }
 0x127   :  { %1289 = vmatprep.subr.bf16.mxu0 %v1419_v42 }
 0x12a   :  { %1290 = vmatpush3.bf16.msra.mxu0 %v1389_v48 }
 0x12b   :  { %1291 = vmatprep.subr.bf16.mxu0 %v1419_v42 }
 0x12e   :  { %1292 = vmatpush3.bf16.msra.mxu0 %v1390_v49 }
 0x12f   :  { %1293 = vmatprep.subr.bf16.mxu0 %v1419_v42 }
 0x132   :  { %1294 = vmatpush3.bf16.msra.mxu0 %v1391_v50 }
 0x133   :  { %1295 = vmatprep.subr.bf16.mxu0 %v1419_v42 }
 0x136   :  { %1296 = vmatpush3.bf16.msra.mxu0 %v1392_v51 }
 0x137   :  { %1297 = vmatprep.subr.bf16.mxu0 %v1419_v42 }
 0x13a   :  { %1298 = vmatpush3.bf16.msra.mxu0 %v1393_v60 }
 0x13b   :  { %1299 = vmatprep.subr.bf16.mxu0 %v1419_v42  ;;  %v1114_v42 = vld [vmem:[%s1796_s8] ss:$0 sm:$0xff] }
 0x13e   :  { %1300 = vmatpush3.bf16.msra.mxu0 %v1394_v61 }
 0x1f4   :  { %v785_v53 = vpop.f32.mrb[8].mxu0 }
 0x1f5   :  { %v786_v54 = vadd.f32 %v1096_v52, %v785_v53  ;;  %v1263_v55 = vpop.f32.mrb[9].mxu0 }
 0x1f6   :  { %v788_v56 = vpop.f32.mrb[10].mxu0 }
 0x1f7   :  { %v791_v57 = vmax.f32 %v786_v54, 0.0  ;;  %v1264_v58 = vpop.f32.mrb[11].mxu0 }
 0x1f9   :  { %v792_v59 = vpack.c.bf16 %v791_v57, %v791_v57 }
 0x1fb   :  { %1282 = vmatmul.mubr.bf16.vlgmr.msra.gmra.mrb[8].mxu1 %v792_v59 }
 0x2ce   :  { %v898_v63 = vpop.f32.mrb[8].mxu1 }
 0x2cf   :  { %v899_v0 = vadd.f32 %v1105_v62, %v898_v63  ;;  %v1283_v1 = vpop.f32.mrb[9].mxu1 }
 0x2d0   :  { %v901_v2 = vpop.f32.mrb[10].mxu1 }
 0x2d1   :  { %v904_v3 = vmax.f32 %v899_v0, 0.0  ;;  %v1284_v4 = vpop.f32.mrb[11].mxu1 }
 0x2d3   :  { %v905_v5 = vpack.c.bf16 %v904_v3, %v904_v3 }
 0x2d5   :  { %1302 = vmatmul.mubr.bf16.vlgmr.msra.gmra.mrb[12].mxu0 %v905_v5 }
 0x3a8   :  { %v1011_v6 = vpop.f32.mrb[12].mxu0 }
 0x3a9   :  { %v1012_v7 = vadd.f32 %v1114_v42, %v1011_v6  ;;  %v1303_v8 = vpop.f32.mrb[13].mxu0 }
 0x3aa   :  { %v1014_v9 = vpop.f32.mrb[14].mxu0 }
 0x3ab   :  { %1017 = vst [vmem:[#allocation2] sm:$0xff] %v1012_v7  ;;  %v1304_v10 = vpop.f32.mrb[15].mxu0 }
 0x3ac   :  { %1406 = shalt.err (!%p1403_p4)
}
 0x3ad   :  { %s1407_s8 = scalar_lea.hbm %s1797_s9, 128 }
 0x3ae   :  { %p1408_p5 = scmp.ne.s32.totalorder %s1797_s9, %s1407_s8  ;;  %p1411_p6 = scmp.lt.u32.totalorder %s1407_s8, %s1797_s9 }
 0x3b0   :  { %p1413_p7 = pnand %p1411_p6, %p1408_p5 }
 0x3b2   :  { %1416 = shalt.err (!%p1413_p7)
}
 0x3b3   :  { %1027 = dma.vmem_to_hbm [thread:$0]  %s1025_s2, 128, %s1797_s9, [#allocation3]  }
 0x3b4   :  { %1417 = dma.done.wait [#allocation3], 128  }
 0x3b5   :  { %1418 = vsyncadd [#allocation3], 4294967168 }
 0x3b6   :  { %1031 = vsyncpa [#allocation3], 1 }

</bundles_post_ra>
